<compile_context>
chip_gen: v7x
topology: tpu7x:2x2x1
jax: 0.10.0
libtpu: 0.0.40
codegen_flags: <defaults>
</compile_context>

<pallas_src>
import functools

import jax
import jax.numpy as jnp
from jax.experimental import pallas as pl
from jax.experimental.pallas import tpu as pltpu

IN_FEATURES = 128
OUT_FEATURES = 16

# Deterministic choices for the module's constructor args (min_value, max_value).
MIN_VALUE = -0.5
MAX_VALUE = 0.5


def _round_up(n, m):
    return -(-n // m) * m


def _linear_clamp_kernel(x_ref, w_ref, b_ref, o_ref, *, min_value, max_value):
    # x_ref: (TB, 128)   w_ref: (128, 16)   b_ref: (1, 16)   o_ref: (TB, 16)
    y = jnp.dot(x_ref[...], w_ref[...], preferred_element_type=jnp.float32)
    y = y + b_ref[...]
    y = jnp.maximum(y, min_value)   # clamp_min
    y = jnp.minimum(y, max_value)   # clamp_max
    o_ref[...] = y                  # already float32; no cast needed


def prepare_params(w, b):
    """Hoisted per-parameter-set prep: torch (out,in) weight -> (in,out), bias -> (1,out)."""
    w_t = jnp.asarray(w, jnp.float32).T.reshape(IN_FEATURES, OUT_FEATURES)
    b2 = jnp.asarray(b, jnp.float32).reshape(1, OUT_FEATURES)
    return w_t, b2


def linear_clamp(x, w_t, b2, min_value=MIN_VALUE, max_value=MAX_VALUE, *, block_b=1024):
    """clamp(x @ w.T + b, min_value, max_value) with x of shape (..., 128).

    w_t: (128, 16) float32  -- pre-transposed weight from prepare_params()
    b2 : (1, 16)  float32
    Returns shape (..., 16), preserving all leading batch dims (torch semantics).
    """
    assert x.shape[-1] == IN_FEATURES, f"last dim must be {IN_FEATURES}, got {x.shape}"
    batch_shape = x.shape[:-1]
    x2d = x.reshape(-1, IN_FEATURES).astype(jnp.float32)
    B = x2d.shape[0]

    # Batch-tile selection:
    #  * 8-aligned (sublane) -- required for the non-final grid blocks.
    #  * >= 2 grid steps whenever B > 8, so v7x's two TensorCores both get work.
    #  * capped at block_b (default 1024) to stay well inside scoped VMEM on all
    #    generations while amortizing the per-grid-step overhead.
    if B <= 8:
        TB = 8
    else:
        TB = min(block_b, _round_up(pl.cdiv(B, 2), 8))
    grid = (pl.cdiv(B, TB),)

    kernel = functools.partial(
        _linear_clamp_kernel,
        min_value=float(min_value),
        max_value=float(max_value),
    )

    cost = pl.CostEstimate(
        flops=2 * B * IN_FEATURES * OUT_FEATURES,
        transcendentals=0,
        bytes_accessed=(B * IN_FEATURES * 4            # x read
                        + IN_FEATURES * OUT_FEATURES * 4  # weight read (once)
                        + OUT_FEATURES * 4                # bias read (once)
                        + B * OUT_FEATURES * 4),          # output write
    )

    out = pl.pallas_call(
        kernel,
        out_shape=jax.ShapeDtypeStruct((B, OUT_FEATURES), jnp.float32),
        grid=grid,
        in_specs=[
            # x: streamed per batch tile.
            pl.BlockSpec((TB, IN_FEATURES), lambda i: (i, 0)),
            # weight / bias: constant index_map -> fetched once, VMEM-resident.
            pl.BlockSpec((IN_FEATURES, OUT_FEATURES), lambda i: (0, 0)),
            pl.BlockSpec((1, OUT_FEATURES), lambda i: (0, 0)),
        ],
        out_specs=pl.BlockSpec((TB, OUT_FEATURES), lambda i: (i, 0)),
        compiler_params=pltpu.CompilerParams(
            dimension_semantics=("parallel",),
        ),
        cost_estimate=cost,
    )(x2d, w_t, b2)

    return out.reshape(*batch_shape, OUT_FEATURES)


if __name__ == "__main__":
    key = jax.random.PRNGKey(0)
    kx, kw, kb, kbatch = jax.random.split(key, 4)

    # Parameters in PyTorch nn.Linear(128, 16) layout + default init scale.
    bound = 1.0 / (IN_FEATURES ** 0.5)
    w = jax.random.uniform(kw, (OUT_FEATURES, IN_FEATURES),
                           minval=-bound, maxval=bound, dtype=jnp.float32)
    b = jax.random.uniform(kb, (OUT_FEATURES,),
                           minval=-bound, maxval=bound, dtype=jnp.float32)

    # Hoisted once per parameter set (not per call).
    w_t, b2 = prepare_params(w, b)

    # --- Case 1: the module's literal forward (single 128-vector) ---
    x1 = jax.random.normal(kx, (IN_FEATURES,), dtype=jnp.float32)
    out = linear_clamp(x1, w_t, b2, MIN_VALUE, MAX_VALUE)
    jax.block_until_ready(out)
    ref = jnp.clip(x1 @ w.T + b, MIN_VALUE, MAX_VALUE)
    assert out.shape == (OUT_FEATURES,)
    assert jnp.allclose(out, ref, atol=1e-4, rtol=1e-4)

    # --- Case 2: batched path (grid >= 2, ragged last block, no batch padding) ---
    xb = jax.random.normal(kbatch, (300, IN_FEATURES), dtype=jnp.float32)
    outb = linear_clamp(xb, w_t, b2, MIN_VALUE, MAX_VALUE)
    jax.block_until_ready(outb)
    refb = jnp.clip(xb @ w.T + b, MIN_VALUE, MAX_VALUE)
    assert outb.shape == (300, OUT_FEATURES)
    assert jnp.allclose(outb, refb, atol=1e-4, rtol=1e-4)

    # --- Case 3: >2-D input, leading batch dims preserved (torch semantics) ---
    x3 = jax.random.normal(kx, (2, 5, IN_FEATURES), dtype=jnp.float32)
    out3 = linear_clamp(x3, w_t, b2, MIN_VALUE, MAX_VALUE)
    jax.block_until_ready(out3)
    ref3 = jnp.clip(x3 @ w.T + b, MIN_VALUE, MAX_VALUE)
    assert out3.shape == (2, 5, OUT_FEATURES)
    assert jnp.allclose(out3, ref3, atol=1e-4, rtol=1e-4)

    print("KERNEL_OK")
</pallas_src>

<mosaic_0001>
module attributes {stable_mosaic.version = 11 : i64} {
  func.func @_linear_clamp_kernel(%arg0: i32, %arg1: memref<8x128xf32, #tpu.memory_space<vmem>>, %arg2: memref<128x16xf32, #tpu.memory_space<vmem>>, %arg3: memref<1x16xf32, #tpu.memory_space<vmem>>, %arg4: memref<8x16xf32, #tpu.memory_space<vmem>>) attributes {dimension_semantics = [#tpu.dimension_semantics<parallel>], iteration_bounds = array<i64: 1>, scalar_prefetch = 0 : i64, scratch_operands = 0 : i64, tpu.core_type = #tpu.core_type<tc>, window_params = [{transform_indices = @transform_0, window_bounds = array<i64: 8, 128>}, {pipeline_mode = #tpu.pipeline_mode<synchronous>, transform_indices = @transform_1, window_bounds = array<i64: 128, 16>}, {pipeline_mode = #tpu.pipeline_mode<synchronous>, transform_indices = @transform_2, window_bounds = array<i64: 1, 16>}, {transform_indices = @transform_3, window_bounds = array<i64: 8, 16>}]} {
    %c0 = arith.constant 0 : index
    %c0_0 = arith.constant 0 : index
    %0 = vector.load %arg1[%c0, %c0_0] : memref<8x128xf32, #tpu.memory_space<vmem>>, vector<8x128xf32>
    %c0_1 = arith.constant 0 : index
    %c0_2 = arith.constant 0 : index
    %1 = vector.load %arg2[%c0_1, %c0_2] : memref<128x16xf32, #tpu.memory_space<vmem>>, vector<128x16xf32>
    %cst = arith.constant dense<0.000000e+00> : vector<8x16xf32>
    %2 = tpu.matmul %0, %1, %cst {dimension_numbers = #tpu.dot_dimension_numbers<[1], [0], [0], [1], [0, 0, 1, 1], [], []>} : vector<8x128xf32>, vector<128x16xf32>, vector<8x16xf32> -> vector<8x16xf32>
    %c0_3 = arith.constant 0 : index
    %c0_4 = arith.constant 0 : index
    %3 = vector.load %arg3[%c0_3, %c0_4] : memref<1x16xf32, #tpu.memory_space<vmem>>, vector<1x16xf32>
    %4 = vector.broadcast %3 : vector<1x16xf32> to vector<8x16xf32>
    %5 = arith.addf %2, %4 : vector<8x16xf32>
    %cst_5 = arith.constant -5.000000e-01 : f32
    %6 = vector.broadcast %cst_5 : f32 to vector<8x16xf32>
    %7 = arith.maximumf %5, %6 : vector<8x16xf32>
    %cst_6 = arith.constant 5.000000e-01 : f32
    %8 = vector.broadcast %cst_6 : f32 to vector<8x16xf32>
    %9 = arith.minimumf %7, %8 : vector<8x16xf32>
    %c0_7 = arith.constant 0 : index
    %c0_8 = arith.constant 0 : index
    %10 = vector.load %arg4[%c0_7, %c0_8] : memref<8x16xf32, #tpu.memory_space<vmem>>, vector<8x16xf32>
    tpu.vector_store %arg4[%c0_7, %c0_8], %9 {strides = array<i32>} : memref<8x16xf32, #tpu.memory_space<vmem>>, vector<8x16xf32>,
    return
  }
  func.func @transform_0(%arg0: i32) -> (i32, i32) {
    %c0_i32 = arith.constant 0 : i32
    %c0_i32_0 = arith.constant 0 : i32
    return %arg0, %c0_i32 : i32, i32
  }
  func.func @transform_1(%arg0: i32) -> (i32, i32) {
    %c0_i32 = arith.constant 0 : i32
    %c0_i32_0 = arith.constant 0 : i32
    %c0_i32_1 = arith.constant 0 : i32
    return %c0_i32, %c0_i32_0 : i32, i32
  }
  func.func @transform_2(%arg0: i32) -> (i32, i32) {
    %c0_i32 = arith.constant 0 : i32
    %c0_i32_0 = arith.constant 0 : i32
    %c0_i32_1 = arith.constant 0 : i32
    return %c0_i32, %c0_i32_0 : i32, i32
  }
  func.func @transform_3(%arg0: i32) -> (i32, i32) {
    %c0_i32 = arith.constant 0 : i32
    %c0_i32_0 = arith.constant 0 : i32
    return %arg0, %c0_i32 : i32, i32
  }
}

</mosaic_0001>

<bundles_post_ra>
// kernel: tpu_custom_call.1
= control target key start
LH: loop header
LB: loop body
LE: loop exit
PB: predicated region body
PF: predicated region fallthrough
CT: control target
= control target key end

     0   :  { %8 = vsyncpa [#allocation3], 0  ;;  %v237_v2 = vmov 0.0|0.0   ;;  %vm238_vm0 = vmmov 0   ;;  %v239_v6 = vmov 0.0   ;;  %vm111_vm1 = vcmask 130048   ;;  %s329_s0 = inlined_call_operand.vmem [shape: f32[1,128], index: 0, kind: input, shape index: {}]   ;;  %s330_s1 = inlined_call_operand.vmem [shape: f32[128,16], index: 1, kind: input, shape index: {}]   ;;  %s331_s2 = inlined_call_operand.vmem [shape: f32[1,16], index: 2, kind: input, shape index: {}]   ;;  %s332_s3 = inlined_call_operand.hbm [shape: f32[1,16], index: 3, kind: output, shape index: {}]  }
   0x1   :  { %v16_v0 = vld [vmem:[%s330_s1] sm:$0xff]  ;;  %v17_v1 = vld [vmem:[%s330_s1 + $0x8] sm:$0xff]  ;;  %183 = vmatprep.subr.bf16.mxu0 %v237_v2  ;;  %v18_v4 = vld [vmem:[%s330_s1 + $0x10] sm:$0xff]  ;;  %180 = vmatprep.mubr.msk.f32.mxu0 %vm238_vm0, %v239_v6 }
   0x2   :  { %v184_v3 = vpack.c.bf16 %v17_v1, %v16_v0  ;;  %v19_v5 = vld [vmem:[%s330_s1 + $0x18] sm:$0xff]  ;;  %v20_v8 = vld [vmem:[%s330_s1 + $0x20] sm:$0xff]  ;;  %v21_v9 = vld [vmem:[%s330_s1 + $0x28] sm:$0xff] }
   0x3   :  { %v187_v7 = vpack.c.bf16 %v19_v5, %v18_v4  ;;  %v190_v10 = vpack.c.bf16 %v21_v9, %v20_v8  ;;  %v22_v11 = vld [vmem:[%s330_s1 + $0x30] sm:$0xff]  ;;  %v23_v12 = vld [vmem:[%s330_s1 + $0x38] sm:$0xff]  ;;  %v24_v14 = vld [vmem:[%s330_s1 + $0x40] sm:$0xff] }
   0x4   :  { %185 = vmatpush3.bf16.msra.mxu0 %v184_v3  ;;  %v193_v13 = vpack.c.bf16 %v23_v12, %v22_v11  ;;  %v25_v15 = vld [vmem:[%s330_s1 + $0x48] sm:$0xff]  ;;  %v26_v17 = vld [vmem:[%s330_s1 + $0x50] sm:$0xff]  ;;  %v27_v18 = vld [vmem:[%s330_s1 + $0x58] sm:$0xff] }
   0x5   :  { %186 = vmatprep.subr.bf16.mxu0 %v237_v2  ;;  %v196_v16 = vpack.c.bf16 %v25_v15, %v24_v14  ;;  %v199_v19 = vpack.c.bf16 %v27_v18, %v26_v17  ;;  %v28_v20 = vld [vmem:[%s330_s1 + $0x60] sm:$0xff]  ;;  %v29_v21 = vld [vmem:[%s330_s1 + $0x68] sm:$0xff]  ;;  %v30_v23 = vld [vmem:[%s330_s1 + $0x70] sm:$0xff] }
   0x6   :  { %v202_v22 = vpack.c.bf16 %v29_v21, %v28_v20  ;;  %v31_v24 = vld [vmem:[%s330_s1 + $0x78] sm:$0xff]  ;;  %v15_v26 = vld [vmem:[%s329_s0] sm:$0xff] }
   0x7   :  { %v205_v25 = vpack.c.bf16 %v31_v24, %v30_v23  ;;  %v129_v27 = vld [vmem:[%s331_s2] ss:$0 sm:$0xff] }
   0x8   :  { %188 = vmatpush3.bf16.msra.mxu0 %v187_v7 }
   0x9   :  { %189 = vmatprep.subr.bf16.mxu0 %v237_v2 }
   0xc   :  { %191 = vmatpush3.bf16.msra.mxu0 %v190_v10 }
   0xd   :  { %192 = vmatprep.subr.bf16.mxu0 %v237_v2 }
  0x10   :  { %194 = vmatpush3.bf16.msra.mxu0 %v193_v13 }
  0x11   :  { %195 = vmatprep.subr.bf16.mxu0 %v237_v2 }
  0x14   :  { %197 = vmatpush3.bf16.msra.mxu0 %v196_v16 }
  0x15   :  { %198 = vmatprep.subr.bf16.mxu0 %v237_v2 }
  0x18   :  { %200 = vmatpush3.bf16.msra.mxu0 %v199_v19 }
  0x19   :  { %201 = vmatprep.subr.bf16.mxu0 %v237_v2 }
  0x1c   :  { %203 = vmatpush3.bf16.msra.mxu0 %v202_v22 }
  0x1d   :  { %204 = vmatprep.subr.bf16.mxu0 %v237_v2 }
  0x20   :  { %206 = vmatpush3.bf16.msra.mxu0 %v205_v25 }
  0x23   :  { %181 = vmatmul.mubr.f32.vlgmr.msra.gmra.mrb[0].mxu0 %v15_v26 }
  0xf6   :  { %v105_v28 = vpop.f32.mrb[0].mxu0 }
  0xf7   :  { %v106_v29 = vadd.f32 %v129_v27, %v105_v28  ;;  %v182_v30 = vpop.f32.mrb[1].mxu0 }
  0xf9   :  { %v130_v31 = vclamps-f32 %v106_v29, 0.5 }
  0xfb   :  { %112 = vst.msk [vmem:[#allocation2] sm:$0xff] %vm111_vm1, %v130_v31 }
  0xfc   :  { %117 = vsyncadd [#allocation3], 112  ;;  %s240_s1 = smov [#allocation2]  }
  0xfd   :  { %s118_s21 = sshll.u32 %s240_s1, 4  ;;  %s119_s21 = int_to_ptr.vmem [resolvable:$true] %s118_s21 }
  0xfe   :  { %s213_s22 = scalar_lea.vmem %s119_s21, 16  ;;  %s217_s23 = scalar_lea.vmem %s119_s21, 128 }
  0xff   :  { %p214_p0 = scmp.ne.s32.totalorder %s119_s21, %s213_s22  ;;  %p218_p1 = scmp.lt.s32.totalorder %s119_s21, %s119_s21 }
 0x100   :  { %p219_p2 = scmp.lt.s32.totalorder %s217_s23, %s213_s22 }
 0x102   :  { %p220_p3 = por %p219_p2, %p218_p1 }
 0x104   :  { %p221_p4 = pnand %p220_p3, %p214_p0 }
 0x106   :  { %224 = shalt.err (!%p221_p4)
}
 0x107   :  { %s225_s24 = scalar_lea.hbm %s332_s3, 16 }
 0x108   :  { %p226_p5 = scmp.ne.s32.totalorder %s332_s3, %s225_s24  ;;  %p229_p6 = scmp.lt.u32.totalorder %s225_s24, %s332_s3 }
 0x10a   :  { %p231_p7 = pnand %p229_p6, %p226_p5 }
 0x10c   :  { %234 = shalt.err (!%p231_p7)
}
 0x10d   :  { %s241_s29 = smov 16   ;;  %s242_s30 = smov 1  }
 0x10e   :  { %124 = dma.vmem_to_hbm [thread:$0]  %s119_s21, 16, %s332_s3, [#allocation3], %s241_s29, %s241_s29, %s242_s30  }
 0x10f   :  { %235 = dma.done.wait [#allocation3], 128  }
 0x110   :  { %236 = vsyncadd [#allocation3], 4294967168 }
 0x111   :  { %128 = vsyncpa [#allocation3], 1 }

</bundles_post_ra>
